<compile_context>
chip_gen: v6e
topology: v6e:2x2x1
jax: 0.10.0
libtpu: 0.0.40
codegen_flags: <defaults>
</compile_context>

<pallas_src>
import functools

import jax
import jax.numpy as jnp
from jax import lax
from jax.experimental import pallas as pl
from jax.experimental.pallas import tpu as pltpu


# ----------------------------- Pallas kernel -------------------------------------


def _warp_kernel(kstart_ref, kcount_ref, idx_ref, w_ref, perm_ref, x_ref, o_ref,
                 *, tk, tn, c):
    # kstart_ref/kcount_ref: (B, nj) int32 in SMEM (scalar prefetch)
    # idx_ref: (4, tn) int32  global input-pixel index of each bilinear tap
    # w_ref:   (4, tn) f32    bilinear weight (0 where tap is out of bounds / padded)
    # perm_ref:(C, C)  f32    one-hot channel-shuffle matrix (identity if not applied)
    # x_ref:   (C, HWp) bf16  whole flattened image for this sample (resident in VMEM)
    # o_ref:   (C, tn)        output-pixel tile
    b = pl.program_id(0)
    j = pl.program_id(1)

    idx = idx_ref[...]                                    # (4, tn) int32
    w = w_ref[...]                                        # (4, tn) f32
    iota = lax.broadcasted_iota(jnp.int32, (tk, tn), 0)   # tile-local 0..tk-1

    k0 = kstart_ref[b, j]
    kc = kcount_ref[b, j]

    def body(i, acc):
        kblk = k0 + i
        local = idx - kblk * tk                           # (4, tn) row subtract
        # Build the (tk, tn) one-hot bilinear matrix tile on-chip (VPU only).
        m = jnp.zeros((tk, tn), jnp.float32)
        for t in range(4):                                # static unroll, 4 taps
            m = m + jnp.where(iota == local[t:t + 1, :], w[t:t + 1, :], 0.0)
        start = pl.multiple_of(kblk * tk, tk)
        x_tile = x_ref[:, pl.ds(start, tk)]               # (C, tk) bf16
        # Gather-via-matmul on the MXU; accumulate in f32 vregs.
        return acc + jnp.dot(x_tile, m.astype(x_tile.dtype),
                             preferred_element_type=jnp.float32)

    acc = lax.fori_loop(0, kc, body, jnp.zeros((c, tn), jnp.float32))

    # Fold the channel shuffle into the output write: out[ci] = acc[perm[ci]].
    perm = perm_ref[...]                                  # (C, C) one-hot rows
    res = jnp.zeros((c, tn), jnp.float32)
    for ci in range(c):                                   # tiny static unroll (VPU)
        res = res + perm[:, ci:ci + 1] * acc[ci:ci + 1, :]
    o_ref[...] = res.astype(o_ref.dtype)


def _run_kernel(x_flat, tap_idx, tap_w, perm_mat, kstart, kcount, tk, tn, out_dtype):
    B, C, HWp = x_flat.shape
    nj = HWp // tn

    # Advisory cost for XLA scheduling: ~2 active 128-wide input blocks per output tile.
    est_k = 2
    flops = 2 * B * nj * est_k * C * tk * tn
    bytes_accessed = B * (C * HWp * x_flat.dtype.itemsize     # image (bf16), once/sample
                          + 8 * HWp * 4                       # tap idx + weights
                          + C * C * 4                         # shuffle matrix
                          + C * HWp * jnp.dtype(out_dtype).itemsize)  # output

    kernel = functools.partial(_warp_kernel, tk=tk, tn=tn, c=C)
    return pl.pallas_call(
        kernel,
        out_shape=jax.ShapeDtypeStruct((B, C, HWp), out_dtype),
        grid_spec=pltpu.PrefetchScalarGridSpec(
            num_scalar_prefetch=2,
            grid=(B, nj),
            in_specs=[
                pl.BlockSpec((None, 4, tn), lambda b, j, ks, kc: (b, 0, j)),
                pl.BlockSpec((None, 4, tn), lambda b, j, ks, kc: (b, 0, j)),
                pl.BlockSpec((None, C, C), lambda b, j, ks, kc: (b, 0, 0)),
                pl.BlockSpec((None, C, HWp), lambda b, j, ks, kc: (b, 0, 0)),
            ],
            out_specs=pl.BlockSpec((None, C, tn), lambda b, j, ks, kc: (b, 0, j)),
        ),
        compiler_params=pltpu.CompilerParams(
            dimension_semantics=("parallel", "parallel"),
        ),
        cost_estimate=pl.CostEstimate(
            flops=flops, transcendentals=0, bytes_accessed=bytes_accessed),
    )(kstart, kcount, tap_idx, tap_w, perm_mat, x_flat)


# ------------------------- Random-parameter glue (plain JAX) ----------------------


def _ctrl_points(n_side: int):
    lin = jnp.linspace(-1.0, 1.0, n_side, dtype=jnp.float32)
    gy, gx = jnp.meshgrid(lin, lin, indexing="ij")
    return jnp.stack([gx.ravel(), gy.ravel()], axis=-1)          # (n, 2) as (x, y)


def _pixel_grid(H: int, W: int):
    ys = jnp.linspace(-1.0, 1.0, H, dtype=jnp.float32)
    xs = jnp.linspace(-1.0, 1.0, W, dtype=jnp.float32)
    gy, gx = jnp.meshgrid(ys, xs, indexing="ij")
    return jnp.stack([gx.ravel(), gy.ravel()], axis=-1)          # (HW, 2) as (x, y)


def _tps_coords(ctrl, targets, pix):
    """Solve TPS interpolant f with f(ctrl_i) = targets_i, evaluate at pix."""
    n = ctrl.shape[0]

    def U(d2):
        return d2 * jnp.log(jnp.maximum(d2, 1e-9))

    K = U(jnp.sum((ctrl[:, None, :] - ctrl[None, :, :]) ** 2, axis=-1))   # (n, n)
    Pm = jnp.concatenate([jnp.ones((n, 1), jnp.float32), ctrl], axis=1)   # (n, 3)
    A = jnp.block([[K, Pm], [Pm.T, jnp.zeros((3, 3), jnp.float32)]])
    rhs = jnp.concatenate([targets, jnp.zeros((3, 2), jnp.float32)], axis=0)
    sol = jnp.linalg.solve(A, rhs)                                        # (n+3, 2)
    w, a = sol[:n], sol[n:]
    Up = U(jnp.sum((pix[:, None, :] - ctrl[None, :, :]) ** 2, axis=-1))   # (HW, n)
    Ppix = jnp.concatenate([jnp.ones((pix.shape[0], 1), jnp.float32), pix], axis=1)
    return Up @ w + Ppix @ a                                              # (HW, 2)


def _bilinear_taps(coords, H, W):
    """4-tap bilinear sampling table (align_corners=True, zeros padding).

    Returns (tap_idx, tap_w): (4, HW) int32 clamped input-pixel indices and f32
    weights (zeroed where the tap falls outside the image).
    """
    gx = (coords[:, 0] + 1.0) * 0.5 * (W - 1)
    gy = (coords[:, 1] + 1.0) * 0.5 * (H - 1)
    x0 = jnp.floor(gx)
    y0 = jnp.floor(gy)
    wx1 = gx - x0
    wx0 = 1.0 - wx1
    wy1 = gy - y0
    wy0 = 1.0 - wy1

    def tap(xi, yi, w):
        valid = (xi >= 0) & (xi <= W - 1) & (yi >= 0) & (yi <= H - 1)
        idx = (jnp.clip(yi, 0, H - 1).astype(jnp.int32) * W
               + jnp.clip(xi, 0, W - 1).astype(jnp.int32))
        return idx, jnp.where(valid, w, 0.0)

    taps = [tap(x0, y0, wx0 * wy0),
            tap(x0 + 1.0, y0, wx1 * wy0),
            tap(x0, y0 + 1.0, wx0 * wy1),
            tap(x0 + 1.0, y0 + 1.0, wx1 * wy1)]
    tap_idx = jnp.stack([t[0] for t in taps], axis=0)   # (4, HW) int32
    tap_w = jnp.stack([t[1] for t in taps], axis=0)     # (4, HW) f32
    return tap_idx, tap_w


def _build_taps(apply_flip, apply_tps, tps_noise, ctrl, pix, H, W):
    # TPS grid (output-pixel -> sampling coords in [-1,1]); identity if not applied.
    tps = _tps_coords(ctrl, ctrl + tps_noise, pix)
    coords = jnp.where(apply_tps, tps, pix)
    # Horizontal flip applied before TPS  <=>  negate the x sampling coord.
    coords = coords.at[:, 0].multiply(jnp.where(apply_flip, -1.0, 1.0))
    return _bilinear_taps(coords, H, W)


# --------------------------------- Module wrapper ---------------------------------


def data_augmentation(x, key, apply_color_jitter: bool = False,
                      p: float = 0.75, tps_scale: float = 0.2, n_ctrl_side: int = 5):
    """Forward pass of DataAugmentation.  x: (B, C, H, W) float32 -> (B, C, H, W)."""
    B, C, H, W = x.shape
    HW = H * W

    k_flip, k_shuf_p, k_perm, k_tps_p, k_tps_n = jax.random.split(key, 5)
    apply_flip = jax.random.bernoulli(k_flip, p, (B,))
    apply_shuffle = jax.random.bernoulli(k_shuf_p, p, (B,))
    apply_tps = jax.random.bernoulli(k_tps_p, p, (B,))
    perm_keys = jax.random.split(k_perm, B)
    perms = jax.vmap(lambda k: jax.random.permutation(k, C))(perm_keys)   # (B, C)

    ctrl = _ctrl_points(n_ctrl_side)                                      # (n, 2)
    pix = _pixel_grid(H, W)                                               # (HW, 2)
    tps_noise = jax.random.uniform(k_tps_n, (B, ctrl.shape[0], 2),
                                   minval=-tps_scale, maxval=tps_scale,
                                   dtype=jnp.float32)

    build = functools.partial(_build_taps, ctrl=ctrl, pix=pix, H=H, W=W)
    tap_idx, tap_w = jax.vmap(build)(apply_flip, apply_tps, tps_noise)    # (B,4,HW)

    # Channel shuffle commutes with the spatial warp; fold it into the kernel's
    # output write via a per-sample one-hot (C, C) matrix (identity if not applied).
    chan = jnp.where(apply_shuffle[:, None], perms,
                     jnp.arange(C, dtype=perms.dtype)[None, :])
    perm_mat = jax.nn.one_hot(chan, C, dtype=jnp.float32)                 # (B, C, C)

    # --- pad the pixel axis to a lane-dense multiple of 128 (never an HW fallback) ---
    tk = 128
    tn = 128
    HWp = ((HW + 127) // 128) * 128
    nj = HWp // tn
    pad = HWp - HW

    x_flat = x.reshape(B, C, HW).astype(jnp.bfloat16)                     # bf16 stream
    tap_idx = tap_idx.astype(jnp.int32)
    tap_w = tap_w.astype(jnp.float32)
    if pad:
        x_flat = jnp.pad(x_flat, ((0, 0), (0, 0), (0, pad)))
        tap_idx = jnp.pad(tap_idx, ((0, 0), (0, 0), (0, pad)))
        tap_w = jnp.pad(tap_w, ((0, 0), (0, 0), (0, pad)))                # padded: w=0

    # --- per (sample, output tile): contiguous range of 128-wide input blocks touched ---
    idx_r = tap_idx.reshape(B, 4, nj, tn)
    w_r = tap_w.reshape(B, 4, nj, tn)
    valid = w_r > 0
    imin = jnp.min(jnp.where(valid, idx_r, HW - 1), axis=(1, 3))          # (B, nj)
    imax = jnp.max(jnp.where(valid, idx_r, 0), axis=(1, 3))               # (B, nj)
    kstart = (imin // tk).astype(jnp.int32)
    kcount = (imax // tk - imin // tk + 1).astype(jnp.int32)
    kcount = jnp.where(jnp.any(valid, axis=(1, 3)), kcount, 0).astype(jnp.int32)

    out_flat = _run_kernel(x_flat, tap_idx, tap_w, perm_mat,
                           kstart, kcount, tk, tn, x.dtype)
    out = out_flat[:, :, :HW].reshape(B, C, H, W)

    if apply_color_jitter:
        # TODO(synk): ColorJitter(0.5,0.5,0.5,0.5) branch (off by default in the module)
        # not implemented; hue/saturation jitter has no clean Pallas hot path here.
        pass
    return out


# -------------------------------------- main --------------------------------------

if __name__ == "__main__":
    key = jax.random.PRNGKey(0)
    k_x, k_aug = jax.random.split(key)
    B, C, H, W = 2, 4, 16, 16
    x = jax.random.normal(k_x, (B, C, H, W), dtype=jnp.float32)

    y = data_augmentation(x, k_aug, apply_color_jitter=False)
    y = jax.block_until_ready(y)

    assert y.shape == x.shape, (y.shape, x.shape)
    assert y.dtype == x.dtype
    assert bool(jnp.all(jnp.isfinite(y)))
    print("KERNEL_OK")
</pallas_src>

<mosaic_0001>
module attributes {stable_mosaic.version = 11 : i64} {
  func.func @_warp_kernel(%arg0: i32, %arg1: i32, %arg2: memref<2x2xi32, #tpu.memory_space<smem>>, %arg3: memref<2x2xi32, #tpu.memory_space<smem>>, %arg4: memref<1x4x128xi32, #tpu.memory_space<vmem>>, %arg5: memref<1x4x128xf32, #tpu.memory_space<vmem>>, %arg6: memref<1x4x4xf32, #tpu.memory_space<vmem>>, %arg7: memref<1x4x256xbf16, #tpu.memory_space<vmem>>, %arg8: memref<1x4x128xf32, #tpu.memory_space<vmem>>) attributes {dimension_semantics = [#tpu.dimension_semantics<parallel>, #tpu.dimension_semantics<parallel>], iteration_bounds = array<i64: 2, 2>, scalar_prefetch = 2 : i64, scratch_operands = 0 : i64, tpu.core_type = #tpu.core_type<tc>, window_params = [{transform_indices = @transform_0, window_bounds = array<i64: 1, 4, 128>}, {transform_indices = @transform_1, window_bounds = array<i64: 1, 4, 128>}, {transform_indices = @transform_2, window_bounds = array<i64: 1, 4, 4>}, {transform_indices = @transform_3, window_bounds = array<i64: 1, 4, 256>}, {transform_indices = @transform_4, window_bounds = array<i64: 1, 4, 128>}]} {
    %c0 = arith.constant 0 : index
    %c0_0 = arith.constant 0 : index
    %c0_1 = arith.constant 0 : index
    %0 = vector.load %arg4[%c0, %c0_0, %c0_1] : memref<1x4x128xi32, #tpu.memory_space<vmem>>, vector<1x4x128xi32>
    %1 = vector.shape_cast %0 : vector<1x4x128xi32> to vector<4x128xi32>
    %c0_2 = arith.constant 0 : index
    %c0_3 = arith.constant 0 : index
    %c0_4 = arith.constant 0 : index
    %2 = vector.load %arg5[%c0_2, %c0_3, %c0_4] : memref<1x4x128xf32, #tpu.memory_space<vmem>>, vector<1x4x128xf32>
    %3 = vector.shape_cast %2 : vector<1x4x128xf32> to vector<4x128xf32>
    %4 = tpu.iota {dimensions = array<i32: 0>} : vector<128x128xi32>
    %5 = arith.index_cast %arg0 : i32 to index
    %6 = arith.index_cast %arg1 : i32 to index
    %7 = memref.load %arg2[%5, %6] : memref<2x2xi32, #tpu.memory_space<smem>>
    %8 = arith.index_cast %arg0 : i32 to index
    %9 = arith.index_cast %arg1 : i32 to index
    %10 = memref.load %arg3[%8, %9] : memref<2x2xi32, #tpu.memory_space<smem>>
    %cst = arith.constant 0.000000e+00 : f32
    %11 = vector.broadcast %cst : f32 to vector<4x128xf32>
    %c0_i32 = arith.constant 0 : i32
    %12 = arith.subi %10, %c0_i32 : i32
    %13 = arith.addi %c0_i32, %12 : i32
    %c1_i32 = arith.constant 1 : i32
    %14 = scf.for %arg9 = %c0_i32 to %13 step %c1_i32 iter_args(%arg10 = %11) -> (vector<4x128xf32>)  : i32 {
      %45 = arith.addi %7, %arg9 : i32
      %c128_i32 = arith.constant 128 : i32
      %46 = arith.muli %45, %c128_i32 : i32
      %47 = vector.broadcast %46 : i32 to vector<4x128xi32>
      %48 = arith.subi %1, %47 : vector<4x128xi32>
      %cst_12 = arith.constant 0.000000e+00 : f32
      %49 = vector.broadcast %cst_12 : f32 to vector<128x128xf32>
      %50 = vector.extract_strided_slice %48 {offsets = [0, 0], sizes = [1, 128], strides = [1, 1]} : vector<4x128xi32> to vector<1x128xi32>
      %51 = vector.broadcast %50 : vector<1x128xi32> to vector<128x128xi32>
      %52 = arith.cmpi eq, %4, %51 : vector<128x128xi32>
      %53 = vector.extract_strided_slice %3 {offsets = [0, 0], sizes = [1, 128], strides = [1, 1]} : vector<4x128xf32> to vector<1x128xf32>
      %cst_13 = arith.constant 0.000000e+00 : f32
      %54 = vector.shape_cast %53 : vector<1x128xf32> to vector<1x128xf32>
      %55 = vector.broadcast %54 : vector<1x128xf32> to vector<128x128xf32>
      %56 = vector.broadcast %cst_13 : f32 to vector<128x128xf32>
      %57 = arith.select %52, %55, %56 : vector<128x128xi1>, vector<128x128xf32>
      %58 = arith.addf %49, %57 : vector<128x128xf32>
      %59 = vector.extract_strided_slice %48 {offsets = [1, 0], sizes = [1, 128], strides = [1, 1]} : vector<4x128xi32> to vector<1x128xi32>
      %60 = vector.broadcast %59 : vector<1x128xi32> to vector<128x128xi32>
      %61 = arith.cmpi eq, %4, %60 : vector<128x128xi32>
      %62 = vector.extract_strided_slice %3 {offsets = [1, 0], sizes = [1, 128], strides = [1, 1]} : vector<4x128xf32> to vector<1x128xf32>
      %cst_14 = arith.constant 0.000000e+00 : f32
      %63 = vector.shape_cast %62 : vector<1x128xf32> to vector<1x128xf32>
      %64 = vector.broadcast %63 : vector<1x128xf32> to vector<128x128xf32>
      %65 = vector.broadcast %cst_14 : f32 to vector<128x128xf32>
      %66 = arith.select %61, %64, %65 : vector<128x128xi1>, vector<128x128xf32>
      %67 = arith.addf %58, %66 : vector<128x128xf32>
      %68 = vector.extract_strided_slice %48 {offsets = [2, 0], sizes = [1, 128], strides = [1, 1]} : vector<4x128xi32> to vector<1x128xi32>
      %69 = vector.broadcast %68 : vector<1x128xi32> to vector<128x128xi32>
      %70 = arith.cmpi eq, %4, %69 : vector<128x128xi32>
      %71 = vector.extract_strided_slice %3 {offsets = [2, 0], sizes = [1, 128], strides = [1, 1]} : vector<4x128xf32> to vector<1x128xf32>
      %cst_15 = arith.constant 0.000000e+00 : f32
      %72 = vector.shape_cast %71 : vector<1x128xf32> to vector<1x128xf32>
      %73 = vector.broadcast %72 : vector<1x128xf32> to vector<128x128xf32>
      %74 = vector.broadcast %cst_15 : f32 to vector<128x128xf32>
      %75 = arith.select %70, %73, %74 : vector<128x128xi1>, vector<128x128xf32>
      %76 = arith.addf %67, %75 : vector<128x128xf32>
      %77 = vector.extract_strided_slice %48 {offsets = [3, 0], sizes = [1, 128], strides = [1, 1]} : vector<4x128xi32> to vector<1x128xi32>
      %78 = vector.broadcast %77 : vector<1x128xi32> to vector<128x128xi32>
      %79 = arith.cmpi eq, %4, %78 : vector<128x128xi32>
      %80 = vector.extract_strided_slice %3 {offsets = [3, 0], sizes = [1, 128], strides = [1, 1]} : vector<4x128xf32> to vector<1x128xf32>
      %cst_16 = arith.constant 0.000000e+00 : f32
      %81 = vector.shape_cast %80 : vector<1x128xf32> to vector<1x128xf32>
      %82 = vector.broadcast %81 : vector<1x128xf32> to vector<128x128xf32>
      %83 = vector.broadcast %cst_16 : f32 to vector<128x128xf32>
      %84 = arith.select %79, %82, %83 : vector<128x128xi1>, vector<128x128xf32>
      %85 = arith.addf %76, %84 : vector<128x128xf32>
      %c128_i32_17 = arith.constant 128 : i32
      %86 = arith.muli %45, %c128_i32_17 : i32
      %87 = tpu.assume_multiple %86, 128 : i32
      %c0_18 = arith.constant 0 : index
      %c0_19 = arith.constant 0 : index
      %88 = arith.index_cast %87 : i32 to index
      %89 = vector.load %arg7[%c0_18, %c0_19, %88] : memref<1x4x256xbf16, #tpu.memory_space<vmem>>, vector<1x4x128xbf16>
      %90 = vector.shape_cast %89 : vector<1x4x128xbf16> to vector<4x128xbf16>
      %91 = arith.truncf %85 : vector<128x128xf32> to vector<128x128xbf16>
      %cst_20 = arith.constant dense<0.000000e+00> : vector<4x128xf32>
      %92 = tpu.matmul %90, %91, %cst_20 {dimension_numbers = #tpu.dot_dimension_numbers<[1], [0], [0], [1], [0, 0, 1, 1], [], []>} : vector<4x128xbf16>, vector<128x128xbf16>, vector<4x128xf32> -> vector<4x128xf32>
      %93 = arith.addf %arg10, %92 : vector<4x128xf32>
      scf.yield %93 : vector<4x128xf32>
    }
    %c0_5 = arith.constant 0 : index
    %c0_6 = arith.constant 0 : index
    %c0_7 = arith.constant 0 : index
    %15 = vector.load %arg6[%c0_5, %c0_6, %c0_7] : memref<1x4x4xf32, #tpu.memory_space<vmem>>, vector<1x4x4xf32>
    %16 = vector.shape_cast %15 : vector<1x4x4xf32> to vector<4x4xf32>
    %cst_8 = arith.constant 0.000000e+00 : f32
    %17 = vector.broadcast %cst_8 : f32 to vector<4x128xf32>
    %18 = vector.extract_strided_slice %16 {offsets = [0, 0], sizes = [4, 1], strides = [1, 1]} : vector<4x4xf32> to vector<4x1xf32>
    %19 = vector.extract_strided_slice %14 {offsets = [0, 0], sizes = [1, 128], strides = [1, 1]} : vector<4x128xf32> to vector<1x128xf32>
    %20 = vector.broadcast %18 : vector<4x1xf32> to vector<4x128xf32>
    %21 = vector.broadcast %19 : vector<1x128xf32> to vector<4x128xf32>
    %22 = arith.mulf %20, %21 : vector<4x128xf32>
    %23 = arith.addf %17, %22 : vector<4x128xf32>
    %24 = vector.extract_strided_slice %16 {offsets = [0, 1], sizes = [4, 1], strides = [1, 1]} : vector<4x4xf32> to vector<4x1xf32>
    %25 = vector.extract_strided_slice %14 {offsets = [1, 0], sizes = [1, 128], strides = [1, 1]} : vector<4x128xf32> to vector<1x128xf32>
    %26 = vector.broadcast %24 : vector<4x1xf32> to vector<4x128xf32>
    %27 = vector.broadcast %25 : vector<1x128xf32> to vector<4x128xf32>
    %28 = arith.mulf %26, %27 : vector<4x128xf32>
    %29 = arith.addf %23, %28 : vector<4x128xf32>
    %30 = vector.extract_strided_slice %16 {offsets = [0, 2], sizes = [4, 1], strides = [1, 1]} : vector<4x4xf32> to vector<4x1xf32>
    %31 = vector.extract_strided_slice %14 {offsets = [2, 0], sizes = [1, 128], strides = [1, 1]} : vector<4x128xf32> to vector<1x128xf32>
    %32 = vector.broadcast %30 : vector<4x1xf32> to vector<4x128xf32>
    %33 = vector.broadcast %31 : vector<1x128xf32> to vector<4x128xf32>
    %34 = arith.mulf %32, %33 : vector<4x128xf32>
    %35 = arith.addf %29, %34 : vector<4x128xf32>
    %36 = vector.extract_strided_slice %16 {offsets = [0, 3], sizes = [4, 1], strides = [1, 1]} : vector<4x4xf32> to vector<4x1xf32>
    %37 = vector.extract_strided_slice %14 {offsets = [3, 0], sizes = [1, 128], strides = [1, 1]} : vector<4x128xf32> to vector<1x128xf32>
    %38 = vector.broadcast %36 : vector<4x1xf32> to vector<4x128xf32>
    %39 = vector.broadcast %37 : vector<1x128xf32> to vector<4x128xf32>
    %40 = arith.mulf %38, %39 : vector<4x128xf32>
    %41 = arith.addf %35, %40 : vector<4x128xf32>
    %c0_9 = arith.constant 0 : index
    %c0_10 = arith.constant 0 : index
    %c0_11 = arith.constant 0 : index
    %42 = vector.load %arg8[%c0_9, %c0_10, %c0_11] : memref<1x4x128xf32, #tpu.memory_space<vmem>>, vector<1x4x128xf32>
    %43 = vector.shape_cast %42 : vector<1x4x128xf32> to vector<4x128xf32>
    %44 = vector.shape_cast %41 : vector<4x128xf32> to vector<1x4x128xf32>
    tpu.vector_store %arg8[%c0_9, %c0_10, %c0_11], %44 {strides = array<i32>} : memref<1x4x128xf32, #tpu.memory_space<vmem>>, vector<1x4x128xf32>,
    return
  }
  func.func @transform_0(%arg0: i32, %arg1: i32, %arg2: memref<2x2xi32, #tpu.memory_space<smem>>, %arg3: memref<2x2xi32, #tpu.memory_space<smem>>) -> (i32, i32, i32) {
    %c0_i32 = arith.constant 0 : i32
    %c0_i32_0 = arith.constant 0 : i32
    return %arg0, %c0_i32, %arg1 : i32, i32, i32
  }
  func.func @transform_1(%arg0: i32, %arg1: i32, %arg2: memref<2x2xi32, #tpu.memory_space<smem>>, %arg3: memref<2x2xi32, #tpu.memory_space<smem>>) -> (i32, i32, i32) {
    %c0_i32 = arith.constant 0 : i32
    %c0_i32_0 = arith.constant 0 : i32
    return %arg0, %c0_i32, %arg1 : i32, i32, i32
  }
  func.func @transform_2(%arg0: i32, %arg1: i32, %arg2: memref<2x2xi32, #tpu.memory_space<smem>>, %arg3: memref<2x2xi32, #tpu.memory_space<smem>>) -> (i32, i32, i32) {
    %c0_i32 = arith.constant 0 : i32
    %c0_i32_0 = arith.constant 0 : i32
    %c0_i32_1 = arith.constant 0 : i32
    return %arg0, %c0_i32, %c0_i32_0 : i32, i32, i32
  }
  func.func @transform_3(%arg0: i32, %arg1: i32, %arg2: memref<2x2xi32, #tpu.memory_space<smem>>, %arg3: memref<2x2xi32, #tpu.memory_space<smem>>) -> (i32, i32, i32) {
    %c0_i32 = arith.constant 0 : i32
    %c0_i32_0 = arith.constant 0 : i32
    %c0_i32_1 = arith.constant 0 : i32
    return %arg0, %c0_i32, %c0_i32_0 : i32, i32, i32
  }
  func.func @transform_4(%arg0: i32, %arg1: i32, %arg2: memref<2x2xi32, #tpu.memory_space<smem>>, %arg3: memref<2x2xi32, #tpu.memory_space<smem>>) -> (i32, i32, i32) {
    %c0_i32 = arith.constant 0 : i32
    %c0_i32_0 = arith.constant 0 : i32
    return %arg0, %c0_i32, %arg1 : i32, i32, i32
  }
}

</mosaic_0001>

<bundles_post_ra>
// kernel: tpu_custom_call.1
= control target key start
LH: loop header
LB: loop body
LE: loop exit
PB: predicated region body
PF: predicated region fallthrough
CT: control target
= control target key end

     0   :  { %s1326_s21 = smov [#allocation3]   ;;  %s1327_s24 = smov [#allocation4]   ;;  %s1987_s0 = inlined_call_operand.hbm [shape: s32[2,2], index: 0, kind: input, shape index: {}]   ;;  %s1988_s2 = inlined_call_operand.hbm [shape: s32[2,4,256], index: 2, kind: input, shape index: {}]   ;;  %s1989_s3 = inlined_call_operand.hbm [shape: f32[2,4,256], index: 3, kind: input, shape index: {}]   ;;  %s1990_s4 = inlined_call_operand.hbm [shape: f32[2,4,4], index: 4, kind: input, shape index: {}]   ;;  %s1991_s5 = inlined_call_operand.vmem [shape: bf16[2,4,256], index: 5, kind: input, shape index: {}]   ;;  %s1992_s6 = inlined_call_operand.hbm [shape: f32[2,4,256], index: 6, kind: output, shape index: {}]   ;;  %s1993_s1 = inlined_call_operand.hbm [shape: s32[2,2], index: 1, kind: input, shape index: {}]  }
   0x1   :  { %2006 = sst [smem:[#allocation24_spill]] %s1989_s3 }
   0x2   :  { %2007 = sst [smem:[#allocation25_spill]] %s1992_s6 }
   0x3   :  { %12 = dma.hbm_to_smem %s1987_s0, 32, %s1326_s21, [#allocation2] }
   0x4   :  { %14 = dma.hbm_to_smem %s1993_s1, 32, %s1327_s24, [#allocation2] }
   0x5   :  { %1252 = dma.done.wait [#allocation2], 64 }
   0x6   :  { %1253 = vsyncadd [#allocation2], 4294967232 }
   0x7   :  { %16 = sfence }
   0x8   :  { %17 = vsyncpa [#allocation6], 0 }
   0x9   :  { %19 = vsyncpa [#allocation6 + $0x1], 0 }
   0xa   :  { %20 = vsyncpa [#allocation9], 0 }
   0xb   :  { %22 = vsyncpa [#allocation9 + $0x1], 0 }
   0xc   :  { %23 = vsyncpa [#allocation7], 0 }
   0xd   :  { %25 = vsyncpa [#allocation7 + $0x1], 0  ;;  %s1379_s27 = smov 0   ;;  %s1381_s28 = smov 0  }
   0xe   :  { %s1383_s29 = smov 0   ;;  %s1385_s0 = smov 0  }
   0xf   :  { %s1387_s30 = smov 0   ;;  %s1389_s1 = smov 0  }
  0x10   :  { %s1391_s7 = smov 0   ;;  %s1393_s8 = smov 0  }
  0x11   :  { %s1395_s9 = smov 0   ;;  %s1397_s10 = smov 0  }
  0x12   :  { %s1399_s11 = smov 0  }
  0x13 LB: > { %2008 = sst [smem:[#allocation17_spill]] %s1284_s0  ;;  %s1435_s12 = sadd.s32 4294967295, %s1312_s11   ;;  %s1312_s11 = sphi %s1399_s11, %s31_s11   ;;  %s1308_s10 = sphi %s1397_s10, %s2045_s10   ;;  %s1304_s9 = sphi %s1395_s9, %s2036_s9   ;;  %s1300_s8 = sphi %s1393_s8, %s2044_s8   ;;  %s1296_s7 = sphi %s1391_s7, %s2035_s7   ;;  %s1292_s1 = sphi %s1389_s1, %s2043_s1   ;;  %s1288_s30 = sphi %s1387_s30, %s2042_s30   ;;  %s1284_s0 = sphi %s1385_s0, %s2041_s0   ;;  %s1280_s29 = sphi %s1383_s29, %s2040_s29   ;;  %s1276_s28 = sphi %s1381_s28, %s2039_s28   ;;  %s1272_s27 = sphi %s1379_s27, %s2038_s27  }
  0x14   : > { %2009 = sst [smem:[#allocation18_spill]] %s1304_s9  ;;  %s864_s13 = sadd.s32 4294967294, %s1312_s11  }
  0x15   : > { %s40_s14 = sadd.s32 1, %s1304_s9  ;;  %s43_s15 = sadd.s32 1, %s1308_s10 }
  0x16   : > { %p41_p0 = scmp.ge.s32.totalorder %s40_s14, 2  ;;  %s52_s16 = sadd.s32 1, %s1292_s1 }
  0x17   : > { %p59_p1 = scmp.ne.s32.totalorder %s1292_s1, %s1288_s30  ;;  %p2003_p2 = scmp.eq.s32.totalorder %s1312_s11, 0 }
  0x18   : > { %s2047_s14 = smov (%p41_p0, %s40_s14), 0  ;;  %s2049_s15 = smov (!%p41_p0, %s43_s15), %s1308_s10 }
  0x19   : > { %2010 = sst [smem:[#allocation19_spill]] %s2047_s14  ;;  %s48_s17 = ssub.s32 %s1304_s9, %s2047_s14 }
  0x1a   : > { %p1451_p3 = por %p2003_p2, %p59_p1  ;;  %p45_p4 = scmp.ge.s32.totalorder %s2049_s15, 2 }
  0x1b   : > { %p65_p5 = scmp.ne.s32.totalorder %s1288_s30, %s1284_s0  ;;  %p2002_p6 = scmp.eq.s32.totalorder %s1435_s12, 0 }
  0x1c   : > { %p171_p7 = scmp.eq.s32.totalorder %s1435_s12, 3  ;;  %s2051_s15 = smov (%p45_p4, %s2049_s15), 0 }
  0x1d   : > { %2012 = sst [smem:[#allocation20_spill]] %s2051_s15  ;;  %p1463_p8 = por %p2002_p6, %p65_p5 }
  0x1e   : > { %p1467_p9 = por %p171_p7, %p59_p1  ;;  %s1473_s21 = ssub.s32 %s1308_s10, %s2051_s15 }
  0x1f   : > { %p177_p10 = scmp.eq.s32.totalorder %s864_s13, 3  ;;  %s49_s22 = sor.u32 %s48_s17, %s1473_s21 }
  0x20   : > { %s2014_s20 = scalar_select %p1467_p9, 1, 0 }
  0x21   : > { %p104_p11 = scmp.eq.s32.totalorder %s1473_s21, 0  ;;  %p50_p12 = scmp.eq.s32.totalorder %s49_s22, 0 }
  0x22   : > { %2015 = sst [smem:[#allocation21_spill]] %s2014_s20  ;;  %p1477_p13 = por %p177_p10, %p65_p5 }
  0x23   : > { %p2001_p0 = scmp.lt.s32.totalorder %s1312_s11, 4  ;;  %s1999_s25 = sand.u32 1, %s1292_s1  }
  0x24   : > { %s2016_s23 = scalar_select %p1477_p13, 1, 0 }
  0x25   : > { %s1483_s24 = scalar_select %p50_p12, %s1292_s1, %s52_s16  }
  0x26   : > { %2017 = sst [smem:[#allocation22_spill]] %s2016_s23  ;;  %s868_s26 = sshll.u32 %s1308_s10, 1 }
  0x27   : > { %2018 = sst [smem:[#allocation23_spill]] %s1483_s24  ;;  %s1489_s14 = sshll.u32 %s1999_s25, 2 }
  0x28   : > { %s206_s15 = sadd.s32 %s1304_s9, %s868_s26  ;;  %p1496_p1 = pnand %p2001_p0, %p1451_p3 }
  0x29   : > { %s869_s0 = sshll.u32 %s206_s15, 6  ;;  %s217_s17 = sand.u32 1, %s1312_s11  }
  0x2a   : > { %s2020_s3 = sld [smem:[#allocation24_spill]]  ;;  %s221_s23 = scalar_lea.vmem [#allocation8], %s1489_s14 }
  0x2b   : > { %s230_s6 = sshll.u32 %s221_s23, 4  ;;  %p875_p4 = scmp.ge.s32.totalorder %s1312_s11, 1  ;;  %s231_s6 = int_to_ptr.vmem [resolvable:$true] %s230_s6 }
  0x2c   : > { %s1506_s25 = scalar_lea.sflag [#allocation9], %s217_s17  ;;  %p1088_p5 = pneg %p1496_p1 }
  0x2d   : > { %s1099_s15 = scalar_lea.vmem %s231_s6, 64  ;;  %s1328_s18 = smov [#allocation8]  }
  0x2e   : > { %p1100_p3 = scmp.ne.s32.totalorder %s231_s6, %s1099_s15  ;;  %s1104_s26 = sshll.u32 %s1328_s18, 4  ;;  %s1105_s26 = int_to_ptr.vmem [resolvable:$false] %s1104_s26 }
  0x2f   : > { %s1106_s9 = scalar_lea.vmem %s1105_s26, 128  ;;  %p1107_p12 = scmp.lt.s32.totalorder %s231_s6, %s1105_s26 }
  0x30   : > { %s228_s24 = scalar_lea.hbm %s2020_s3, %s869_s0  ;;  %p1102_p7 = pnand %p1100_p3, %p1088_p5 }
  0x31   : > { %p1108_p0 = scmp.lt.s32.totalorder %s1106_s9, %s1099_s15 }
  0x32   : > { %p1103_p10 = pneg %p1102_p7 }
  0x33   : > { %p1109_p6 = por %p1108_p0, %p1107_p12 }
  0x35   : > { %p1110_p2 = pnand %p1109_p6, %p1103_p10 }
  0x37   : > { %1113 = shalt.err (!%p1110_p2)
}
  0x38   : > { %935 = dma.hbm_to_vmem [thread:$0]  (!%p1496_p1), %s228_s24, 64, %s231_s6, %s1506_s25  }
  0x39   : > { %p261_p3 = scmp.lt.s32.totalorder %s1312_s11, 5  ;;  %s208_s22 = scalar_lea.hbm %s1988_s2, %s869_s0 }
  0x3a   : > { %s201_s16 = scalar_lea.vmem [#allocation5], %s1489_s14  ;;  %s2022_s18 = sand.u32 1, %s1292_s1  }
  0x3b   : > { %p1519_p7 = pnand %p875_p4, %p261_p3  ;;  %s210_s15 = sshll.u32 %s201_s16, 4  ;;  %s211_s15 = int_to_ptr.vmem [resolvable:$true] %s210_s15 }
  0x3c   : > { %s198_s26 = scalar_lea.sflag [#allocation6], %s2022_s18  ;;  %s1127_s3 = scalar_lea.vmem %s211_s15, 64 }
  0x3d   : > { %p1128_p2 = scmp.ne.s32.totalorder %s211_s15, %s1127_s3  ;;  %s1329_s6 = smov [#allocation5]  }
  0x3e   : > { %s1132_s24 = sshll.u32 %s1329_s6, 4  ;;  %s1133_s24 = int_to_ptr.vmem [resolvable:$false] %s1132_s24 }
  0x3f   : > { %p1130_p6 = pnand %p1128_p2, %p1088_p5  ;;  %s1134_s20 = scalar_lea.vmem %s1133_s24, 128 }
  0x40   : > { %p1135_p4 = scmp.lt.s32.totalorder %s211_s15, %s1133_s24  ;;  %p1136_p10 = scmp.lt.s32.totalorder %s1134_s20, %s1127_s3 }
  0x41   : > { %p1131_p0 = pneg %p1130_p6 }
  0x42   : > { %p1137_p12 = por %p1136_p10, %p1135_p4 }
  0x44   : > { %p1138_p3 = pnand %p1137_p12, %p1131_p0 }
  0x46   : > { %1141 = shalt.err (!%p1138_p3)
}
  0x47   : > { %932 = dma.hbm_to_vmem [thread:$0]  (!%p1496_p1), %s208_s22, 64, %s211_s15, %s198_s26  }
  0x48   : > { %s106_s0 = sadd.s32 1, %s1280_s29  ;;  %p113_p5 = scmp.ne.s32.totalorder %s1280_s29, %s1276_s28 }
  0x49   : > { %s1538_s3 = scalar_select %p104_p11, %s1280_s29, %s106_s0  }
  0x4a   : > { %p119_p2 = scmp.ne.s32.totalorder %s1276_s28, %s1272_s27  ;;  %s239_s14 = sand.u32 1, %s1280_s29  }
  0x4b   : > { %s874_s20 = sshll.u32 %s1308_s10, 6  ;;  %p2023_p6 = scmp.eq.s32.totalorder %s1312_s11, 0 }
  0x4c   : > { %p2024_p4 = scmp.eq.s32.totalorder %s1435_s12, 0  ;;  %s873_s17 = sshll.u32 %s239_s14, 2 }
  0x4d   : > { %p115_p0 = por %p113_p5, %p2023_p6  ;;  %s246_s22 = scalar_lea.hbm %s1990_s4, %s874_s20 }
  0x4e   : > { %p1550_p10 = por %p119_p2, %p2024_p4  ;;  %p2026_p1 = scmp.lt.s32.totalorder %s1312_s11, 4 }
  0x4f   : > { %s241_s27 = scalar_lea.vmem [#allocation10], %s873_s17  ;;  %s1330_s26 = smov [#allocation10]  }
  0x50   : > { %p1559_p12 = pnand %p2026_p1, %p115_p0  ;;  %s248_s15 = sshll.u32 %s241_s27, 4  ;;  %s249_s15 = int_to_ptr.vmem [resolvable:$true] %s248_s15 }
  0x51   : > { %s1155_s18 = scalar_lea.vmem %s249_s15, 64  ;;  %s1160_s6 = sshll.u32 %s1330_s26, 4  ;;  %s1161_s6 = int_to_ptr.vmem [resolvable:$false] %s1160_s6 }
  0x52   : > { %p1144_p11 = pneg %p1559_p12  ;;  %p1156_p3 = scmp.ne.s32.totalorder %s249_s15, %s1155_s18 }
  0x53   : > { %s1162_s24 = scalar_lea.vmem %s1161_s6, 128  ;;  %p1163_p6 = scmp.lt.s32.totalorder %s249_s15, %s1161_s6 }
  0x54   : > { %p1158_p5 = pnand %p1156_p3, %p1144_p11  ;;  %p1164_p4 = scmp.lt.s32.totalorder %s1162_s24, %s1155_s18 }
  0x56   : > { %p1159_p2 = pneg %p1158_p5  ;;  %p1165_p0 = por %p1164_p4, %p1163_p6 }
  0x58   : > { %p1166_p1 = pnand %p1165_p0, %p1159_p2 }
  0x5a   : > { %1169 = shalt.err (!%p1166_p1)
}
  0x5b   : > { %938 = dma.hbm_to_vmem [thread:$0]  (!%p1559_p12), %s246_s22, 64, %s249_s15, %s1506_s25  }
  0x5c   : > { %265 = sbr.rel (%p1519_p7) target bundleno = 536 (0x218), region = 36  ;;  %s1571_s0 = sand.u32 (!%p1519_p7), 1, %s1288_s30  }
  0x5d   : > { %s1574_s14 = sshll.u32 (!%p1519_p7), %s1571_s0, 2  ;;  %s268_s20 = scalar_lea.sflag (!%p1519_p7), [#allocation6], %s1571_s0 }
  0x5e   : > { %s271_s17 = scalar_lea.vmem (!%p1519_p7), [#allocation5], %s1574_s14 }
  0x61   : > { %1255 = dma.done.wait (%p1463_p8), %s268_s20, 64  }
  0x62   : > { %1257 = vsyncadd (%p1463_p8), %s268_s20, 4294967232  ;;  %s276_s25 = sand.u32 1, %s1435_s12   ;;  %s280_s9 = scalar_lea.vmem [#allocation8], %s1574_s14 }
  0x63   : > { %s277_s23 = scalar_lea.sflag [#allocation9], %s276_s25 }
  0x64   : > { %1259 = dma.done.wait (%p1463_p8), %s277_s23, 64  }
  0x65   : > { %1261 = vsyncadd (%p1463_p8), %s277_s23, 4294967232  ;;  %s287_s16 = sand.u32 1, %s1276_s28  }
  0x66   : > { %s1589_s22 = sshll.u32 %s287_s16, 2 }
  0x67   : > { %s289_s21 = scalar_lea.vmem [#allocation10], %s1589_s22 }
  0x68   : > { %1263 = dma.done.wait (%p1550_p10), %s277_s23, 64  }
  0x69   : > { %1265 = vsyncadd (%p1550_p10), %s277_s23, 4294967232  ;;  %s354_s12 = sshra.s32 %s1296_s7, 7  ;;  %s359_s27 = sand.u32 127, %s1296_s7  ;;  %v337_v0 = vlaneseq  ;;  %v1645_v14 = vld [vmem:[%s271_s17] sm:$0xf]  ;;  %v1667_v19 = vmov 0.0  }
  0x6a   : > { %s356_s19 = sadd.s32 %s1300_s8, %s354_s12  ;;  %p329_p8 = scmp.lt.s32.totalorder %s1300_s8, 1  ;;  %v1649_v15 = vld [vmem:[%s280_s9] sm:$0xf] }
  0x6b   : > { %s882_s15 = sshll.u32 %s356_s19, 7  ;;  %v1600_v1 = vshrl.u32 %v337_v0, 7  ;;  %s328_s17 = scalar_lea.vmem [#allocation11], %s1574_s14 }
  0x6c   : > { %s360_s18 = sadd.s32 %s882_s15, %s359_s27 }
  0x6d   : > { %s1602_s26 = sld [smem:[#allocation3 + %s360_s18]]  ;;  %v1605_v2 = vadd.s32 8, %v1600_v1  ;;  %v1608_v3 = vadd.s32 16, %v1600_v1  ;;  %v1611_v4 = vadd.s32 24, %v1600_v1  ;;  %v1614_v5 = vadd.s32 32, %v1600_v1 }
  0x6e   : > { %s1616_s13 = sld [smem:[#allocation4 + %s360_s18]]  ;;  %v1619_v6 = vadd.s32 40, %v1600_v1  ;;  %v1622_v7 = vadd.s32 48, %v1600_v1  ;;  %v1625_v8 = vadd.s32 56, %v1600_v1  ;;  %v1628_v9 = vadd.s32 64, %v1600_v1 }
  0x6f   : > { %s330_s6 = scalar_select %p329_p8, %s1300_s8, 1  ;;  %v1632_v10 = vadd.s32 72, %v1600_v1  ;;  %v1635_v11 = vadd.s32 80, %v1600_v1  ;;  %v1638_v12 = vadd.s32 88, %v1600_v1  ;;  %v1641_v13 = vadd.s32 96, %v1600_v1 }
  0x70   : > { %v1652_v16 = vadd.s32 104, %v1600_v1  ;;  %v1655_v17 = vadd.s32 112, %v1600_v1  ;;  %v1658_v18 = vadd.s32 120, %v1600_v1 }
  0x71   : > { %s891_s24 = sshll.u32 %s330_s6, 2 }
  0x72   : > { %s1663_s23 = scalar_lea.vmem %s1991_s5, %s891_s24 }
  0x74   : > { %p883_p7 = scmp.le.s32.totalorder %s1616_s13, 0 }
  0x75   : > { %s1671_s9 = smov (!%p883_p7), 0  }
  0x76   : > { %799 = sbr.rel (%p883_p7) target bundleno = 384 (0x180), region = 110 }
  0x7b   : > { %v1669_v20 = vmov 0.0  }
  0x7c LB: >> { %v1331_v21 = vmov 0.0   ;;  %s370_s16 = sadd.s32 %s1320_s9, %s1602_s26  ;;  %v376_v22 = vsub.s32 0, %v1600_v1  ;;  %v432_v23 = vsub.s32 1, %v1600_v1  ;;  %vm1332_vm0 = vmmov 0   ;;  %s366_s9 = sadd.s32 1, %s1320_s9   ;;  %s1320_s9 = sphi %s1671_s9, %s366_s9   ;;  %v1316_v20 = vphi %v1669_v20, %v2028_v20  }
  0x7d   : >> { %901 = vmatprep.subr.bf16.mxu0 %v1331_v21  ;;  %917 = vmatprep.mubr.msk.bf16.mxu0 %vm1332_vm0, %v1331_v21  ;;  %s1685_s12 = sshll.u32 %s370_s16, 7  ;;  %v488_v24 = vsub.s32 2, %v1600_v1  ;;  %v544_v26 = vsub.s32 3, %v1600_v1  ;;  %p365_p10 = scmp.ge.s32.totalorder %s366_s9, %s1616_s13 }
  0x7e   : >> { %v372_v25 = vstv %s1685_s12  ;;  %v1692_v28 = vrot.slane %v1649_v15, %v376_v22  ;;  %v1695_v29 = vrot.slane %v1649_v15, %v432_v23  ;;  %s598_s27 = sshra.s32 %s1685_s12, 7 }
  0x7f   : >> { %v373_v27 = vsub.s32 %v1645_v14, %v372_v25  ;;  %v1704_v33 = vrot.slane %v1649_v15, %v488_v24  ;;  %v1709_v35 = vrot.slane %v1649_v15, %v544_v26  ;;  %s885_s19 = sshll.u32 %s598_s27, 1 }
  0x80   : >> { %s601_s15 = scalar_lea.vmem %s1663_s23, %s885_s19 }
  0x81   : >> { %v1697_v30 = vrot.slane %v373_v27, %v376_v22  ;;  %v1699_v31 = vrot.slane %v373_v27, %v432_v23  ;;  %v1701_v32 = vrot.slane %v373_v27, %v488_v24  ;;  %v1706_v34 = vrot.slane %v373_v27, %v544_v26 }
  0x83   : >> { %vm392_vm1 = vcmp.eq.s32.totalorder %v1655_v17, %v1697_v30  ;;  %vm393_vm2 = vcmp.eq.s32.totalorder %v1658_v18, %v1697_v30  ;;  %vm448_vm3 = vcmp.eq.s32.totalorder %v1655_v17, %v1699_v31  ;;  %vm449_vm4 = vcmp.eq.s32.totalorder %v1658_v18, %v1699_v31 }
  0x84   : >> { %v412_v36 = vsel %vm392_vm1, %v1692_v28, 0.0  ;;  %v413_v37 = vsel %vm393_vm2, %v1692_v28, 0.0  ;;  %v468_v38 = vsel %vm448_vm3, %v1695_v29, 0.0  ;;  %v469_v39 = vsel %vm449_vm4, %v1695_v29, 0.0 }
  0x85   : >> { %v484_v40 = vadd.f32 %v468_v38, %v412_v36  ;;  %v485_v41 = vadd.f32 %v469_v39, %v413_v37  ;;  %vm504_vm5 = vcmp.eq.s32.totalorder %v1655_v17, %v1701_v32  ;;  %vm505_vm6 = vcmp.eq.s32.totalorder %v1658_v18, %v1701_v32 }
  0x86   : >> { %v524_v42 = vsel %vm504_vm5, %v1704_v33, 0.0  ;;  %v525_v43 = vsel %vm505_vm6, %v1704_v33, 0.0  ;;  %vm560_vm7 = vcmp.eq.s32.totalorder %v1655_v17, %v1706_v34  ;;  %vm561_vm8 = vcmp.eq.s32.totalorder %v1658_v18, %v1706_v34 }
  0x87   : >> { %v540_v44 = vadd.f32 %v524_v42, %v484_v40  ;;  %v541_v45 = vadd.f32 %v525_v43, %v485_v41  ;;  %v580_v46 = vsel %vm560_vm7, %v1709_v35, 0.0  ;;  %v581_v47 = vsel %vm561_vm8, %v1709_v35, 0.0 }
  0x88   : >> { %vm390_vm9 = vcmp.eq.s32.totalorder %v1641_v13, %v1697_v30  ;;  %vm391_vm10 = vcmp.eq.s32.totalorder %v1652_v16, %v1697_v30  ;;  %vm446_vm11 = vcmp.eq.s32.totalorder %v1641_v13, %v1699_v31  ;;  %vm447_vm12 = vcmp.eq.s32.totalorder %v1652_v16, %v1699_v31 }
  0x89   : >> { %v596_v48 = vadd.f32 %v580_v46, %v540_v44  ;;  %v597_v49 = vadd.f32 %v581_v47, %v541_v45  ;;  %v410_v50 = vsel %vm390_vm9, %v1692_v28, 0.0  ;;  %v411_v51 = vsel %vm391_vm10, %v1692_v28, 0.0 }
  0x8a   : >> { %v466_v52 = vsel %vm446_vm11, %v1695_v29, 0.0  ;;  %v467_v53 = vsel %vm447_vm12, %v1695_v29, 0.0  ;;  %vm502_vm13 = vcmp.eq.s32.totalorder %v1641_v13, %v1701_v32  ;;  %vm503_vm14 = vcmp.eq.s32.totalorder %v1652_v16, %v1701_v32 }
  0x8b   : >> { %v610_v54 = vpack.c.bf16 %v597_v49, %v596_v48  ;;  %v482_v55 = vadd.f32 %v466_v52, %v410_v50  ;;  %v483_v56 = vadd.f32 %v467_v53, %v411_v51  ;;  %v522_v57 = vsel %vm502_vm13, %v1704_v33, 0.0 }
  0x8c   : >> { %v523_v58 = vsel %vm503_vm14, %v1704_v33, 0.0  ;;  %vm558_vm15 = vcmp.eq.s32.totalorder %v1641_v13, %v1706_v34  ;;  %vm559_vm0 = vcmp.eq.s32.totalorder %v1652_v16, %v1706_v34  ;;  %vm388_vm1 = vcmp.eq.s32.totalorder %v1635_v11, %v1697_v30 }
  0x8d   : >> { %902 = vmatpush3.bf16.msra.mxu0 %v610_v54  ;;  %v538_v59 = vadd.f32 %v522_v57, %v482_v55  ;;  %v539_v60 = vadd.f32 %v523_v58, %v483_v56  ;;  %v578_v61 = vsel %vm558_vm15, %v1709_v35, 0.0  ;;  %v579_v62 = vsel %vm559_vm0, %v1709_v35, 0.0 }
  0x8e   : >> { %903 = vmatprep.subr.bf16.mxu0 %v1331_v21  ;;  %vm389_vm2 = vcmp.eq.s32.totalorder %v1638_v12, %v1697_v30  ;;  %v408_v63 = vsel %vm388_vm1, %v1692_v28, 0.0  ;;  %vm444_vm3 = vcmp.eq.s32.totalorder %v1635_v11, %v1699_v31  ;;  %vm445_vm4 = vcmp.eq.s32.totalorder %v1638_v12, %v1699_v31 }
  0x8f   : >> { %v594_v0 = vadd.f32 %v578_v61, %v538_v59  ;;  %v595_v19 = vadd.f32 %v579_v62, %v539_v60  ;;  %v409_v22 = vsel %vm389_vm2, %v1692_v28, 0.0  ;;  %v464_v23 = vsel %vm444_vm3, %v1695_v29, 0.0 }
  0x90   : >> { %v465_v24 = vsel %vm445_vm4, %v1695_v29, 0.0  ;;  %v480_v25 = vadd.f32 %v464_v23, %v408_v63  ;;  %vm500_vm5 = vcmp.eq.s32.totalorder %v1635_v11, %v1701_v32  ;;  %vm501_vm6 = vcmp.eq.s32.totalorder %v1638_v12, %v1701_v32 }
  0x91   : >> { %v609_v26 = vpack.c.bf16 %v595_v19, %v594_v0  ;;  %v481_v27 = vadd.f32 %v465_v24, %v409_v22  ;;  %v520_v36 = vsel %vm500_vm5, %v1704_v33, 0.0  ;;  %v521_v37 = vsel %vm501_vm6, %v1704_v33, 0.0 }
  0x92   : >> { %v536_v38 = vadd.f32 %v520_v36, %v480_v25  ;;  %vm556_vm7 = vcmp.eq.s32.totalorder %v1635_v11, %v1706_v34  ;;  %vm557_vm8 = vcmp.eq.s32.totalorder %v1638_v12, %v1706_v34  ;;  %vm386_vm9 = vcmp.eq.s32.totalorder %v1628_v9, %v1697_v30 }
  0x93   : >> { %904 = vmatpush3.bf16.msra.mxu0 %v609_v26  ;;  %v537_v39 = vadd.f32 %v521_v37, %v481_v27  ;;  %v576_v40 = vsel %vm556_vm7, %v1709_v35, 0.0  ;;  %v577_v41 = vsel %vm557_vm8, %v1709_v35, 0.0  ;;  %vm387_vm10 = vcmp.eq.s32.totalorder %v1632_v10, %v1697_v30 }
  0x94   : >> { %905 = vmatprep.subr.bf16.mxu0 %v1331_v21  ;;  %v592_v42 = vadd.f32 %v576_v40, %v536_v38  ;;  %v406_v43 = vsel %vm386_vm9, %v1692_v28, 0.0  ;;  %v407_v44 = vsel %vm387_vm10, %v1692_v28, 0.0  ;;  %vm442_vm11 = vcmp.eq.s32.totalorder %v1628_v9, %v1699_v31 }
  0x95   : >> { %v593_v45 = vadd.f32 %v577_v41, %v537_v39  ;;  %vm443_vm12 = vcmp.eq.s32.totalorder %v1632_v10, %v1699_v31  ;;  %v462_v46 = vsel %vm442_vm11, %v1695_v29, 0.0  ;;  %vm498_vm13 = vcmp.eq.s32.totalorder %v1628_v9, %v1701_v32 }
  0x96   : >> { %v463_v47 = vsel %vm443_vm12, %v1695_v29, 0.0  ;;  %v478_v48 = vadd.f32 %v462_v46, %v406_v43  ;;  %vm499_vm14 = vcmp.eq.s32.totalorder %v1632_v10, %v1701_v32  ;;  %v518_v49 = vsel %vm498_vm13, %v1704_v33, 0.0 }
  0x97   : >> { %v608_v50 = vpack.c.bf16 %v593_v45, %v592_v42  ;;  %v479_v51 = vadd.f32 %v463_v47, %v407_v44  ;;  %v519_v52 = vsel %vm499_vm14, %v1704_v33, 0.0  ;;  %vm554_vm15 = vcmp.eq.s32.totalorder %v1628_v9, %v1706_v34 }
  0x98   : >> { %v534_v53 = vadd.f32 %v518_v49, %v478_v48  ;;  %vm555_vm0 = vcmp.eq.s32.totalorder %v1632_v10, %v1706_v34  ;;  %v574_v54 = vsel %vm554_vm15, %v1709_v35, 0.0  ;;  %vm384_vm1 = vcmp.eq.s32.totalorder %v1622_v7, %v1697_v30 }
  0x99   : >> { %906 = vmatpush3.bf16.msra.mxu0 %v608_v50  ;;  %v535_v55 = vadd.f32 %v519_v52, %v479_v51  ;;  %v575_v56 = vsel %vm555_vm0, %v1709_v35, 0.0  ;;  %vm385_vm2 = vcmp.eq.s32.totalorder %v1625_v8, %v1697_v30  ;;  %v404_v57 = vsel %vm384_vm1, %v1692_v28, 0.0 }
  0x9a   : >> { %907 = vmatprep.subr.bf16.mxu0 %v1331_v21  ;;  %v590_v58 = vadd.f32 %v574_v54, %v534_v53  ;;  %v405_v59 = vsel %vm385_vm2, %v1692_v28, 0.0  ;;  %vm440_vm3 = vcmp.eq.s32.totalorder %v1622_v7, %v1699_v31  ;;  %vm441_vm4 = vcmp.eq.s32.totalorder %v1625_v8, %v1699_v31 }
  0x9b   : >> { %v591_v60 = vadd.f32 %v575_v56, %v535_v55  ;;  %v460_v61 = vsel %vm440_vm3, %v1695_v29, 0.0  ;;  %v461_v62 = vsel %vm441_vm4, %v1695_v29, 0.0  ;;  %vm496_vm5 = vcmp.eq.s32.totalorder %v1622_v7, %v1701_v32 }
  0x9c   : >> { %v476_v63 = vadd.f32 %v460_v61, %v404_v57  ;;  %v477_v0 = vadd.f32 %v461_v62, %v405_v59  ;;  %vm497_vm6 = vcmp.eq.s32.totalorder %v1625_v8, %v1701_v32  ;;  %v516_v19 = vsel %vm496_vm5, %v1704_v33, 0.0 }
  0x9d   : >> { %v607_v22 = vpack.c.bf16 %v591_v60, %v590_v58  ;;  %v517_v23 = vsel %vm497_vm6, %v1704_v33, 0.0  ;;  %vm552_vm7 = vcmp.eq.s32.totalorder %v1622_v7, %v1706_v34  ;;  %vm553_vm8 = vcmp.eq.s32.totalorder %v1625_v8, %v1706_v34 }
  0x9e   : >> { %v532_v24 = vadd.f32 %v516_v19, %v476_v63  ;;  %v533_v25 = vadd.f32 %v517_v23, %v477_v0  ;;  %v572_v26 = vsel %vm552_vm7, %v1709_v35, 0.0  ;;  %v573_v27 = vsel %vm553_vm8, %v1709_v35, 0.0 }
  0x9f   : >> { %908 = vmatpush3.bf16.msra.mxu0 %v607_v22  ;;  %vm382_vm9 = vcmp.eq.s32.totalorder %v1614_v5, %v1697_v30  ;;  %vm383_vm10 = vcmp.eq.s32.totalorder %v1619_v6, %v1697_v30  ;;  %vm438_vm11 = vcmp.eq.s32.totalorder %v1614_v5, %v1699_v31  ;;  %vm439_vm12 = vcmp.eq.s32.totalorder %v1619_v6, %v1699_v31 }
  0xa0   : >> { %909 = vmatprep.subr.bf16.mxu0 %v1331_v21  ;;  %v588_v36 = vadd.f32 %v572_v26, %v532_v24  ;;  %v589_v37 = vadd.f32 %v573_v27, %v533_v25  ;;  %v402_v38 = vsel %vm382_vm9, %v1692_v28, 0.0  ;;  %v403_v39 = vsel %vm383_vm10, %v1692_v28, 0.0 }
  0xa1   : >> { %v458_v40 = vsel %vm438_vm11, %v1695_v29, 0.0  ;;  %v459_v41 = vsel %vm439_vm12, %v1695_v29, 0.0  ;;  %vm494_vm13 = vcmp.eq.s32.totalorder %v1614_v5, %v1701_v32  ;;  %vm495_vm14 = vcmp.eq.s32.totalorder %v1619_v6, %v1701_v32 }
  0xa2   : >> { %v606_v42 = vpack.c.bf16 %v589_v37, %v588_v36  ;;  %v474_v43 = vadd.f32 %v458_v40, %v402_v38  ;;  %v475_v44 = vadd.f32 %v459_v41, %v403_v39  ;;  %v514_v45 = vsel %vm494_vm13, %v1704_v33, 0.0 }
  0xa3   : >> { %v515_v46 = vsel %vm495_vm14, %v1704_v33, 0.0  ;;  %vm550_vm15 = vcmp.eq.s32.totalorder %v1614_v5, %v1706_v34  ;;  %vm551_vm0 = vcmp.eq.s32.totalorder %v1619_v6, %v1706_v34  ;;  %vm380_vm1 = vcmp.eq.s32.totalorder %v1608_v3, %v1697_v30 }
  0xa4   : >> { %910 = vmatpush3.bf16.msra.mxu0 %v606_v42  ;;  %v530_v47 = vadd.f32 %v514_v45, %v474_v43  ;;  %v531_v48 = vadd.f32 %v515_v46, %v475_v44  ;;  %v570_v49 = vsel %vm550_vm15, %v1709_v35, 0.0  ;;  %v571_v50 = vsel %vm551_vm0, %v1709_v35, 0.0  ;;  %v602_v42 = vld [vmem:[%s601_s15] sm:$0x3] }
  0xa5   : >> { %911 = vmatprep.subr.bf16.mxu0 %v1331_v21  ;;  %vm381_vm2 = vcmp.eq.s32.totalorder %v1611_v4, %v1697_v30  ;;  %v400_v51 = vsel %vm380_vm1, %v1692_v28, 0.0  ;;  %vm436_vm3 = vcmp.eq.s32.totalorder %v1608_v3, %v1699_v31  ;;  %vm437_vm4 = vcmp.eq.s32.totalorder %v1611_v4, %v1699_v31 }
  0xa6   : >> { %v586_v52 = vadd.f32 %v570_v49, %v530_v47  ;;  %v587_v53 = vadd.f32 %v571_v50, %v531_v48  ;;  %v401_v54 = vsel %vm381_vm2, %v1692_v28, 0.0  ;;  %v456_v55 = vsel %vm436_vm3, %v1695_v29, 0.0 }
  0xa7   : >> { %v457_v56 = vsel %vm437_vm4, %v1695_v29, 0.0  ;;  %v472_v57 = vadd.f32 %v456_v55, %v400_v51  ;;  %vm492_vm5 = vcmp.eq.s32.totalorder %v1608_v3, %v1701_v32  ;;  %vm493_vm6 = vcmp.eq.s32.totalorder %v1611_v4, %v1701_v32 }
  0xa8   : >> { %v605_v58 = vpack.c.bf16 %v587_v53, %v586_v52  ;;  %v473_v59 = vadd.f32 %v457_v56, %v401_v54  ;;  %v512_v60 = vsel %vm492_vm5, %v1704_v33, 0.0  ;;  %v513_v61 = vsel %vm493_vm6, %v1704_v33, 0.0 }
  0xa9   : >> { %v528_v62 = vadd.f32 %v512_v60, %v472_v57  ;;  %vm548_vm7 = vcmp.eq.s32.totalorder %v1608_v3, %v1706_v34  ;;  %vm549_vm8 = vcmp.eq.s32.totalorder %v1611_v4, %v1706_v34  ;;  %vm378_vm9 = vcmp.eq.s32.totalorder %v1600_v1, %v1697_v30 }
  0xaa   : >> { %912 = vmatpush3.bf16.msra.mxu0 %v605_v58  ;;  %v529_v63 = vadd.f32 %v513_v61, %v473_v59  ;;  %v568_v0 = vsel %vm548_vm7, %v1709_v35, 0.0  ;;  %v569_v19 = vsel %vm549_vm8, %v1709_v35, 0.0  ;;  %vm379_vm10 = vcmp.eq.s32.totalorder %v1605_v2, %v1697_v30 }
  0xab   : >> { %913 = vmatprep.subr.bf16.mxu0 %v1331_v21  ;;  %v584_v22 = vadd.f32 %v568_v0, %v528_v62  ;;  %v398_v23 = vsel %vm378_vm9, %v1692_v28, 0.0  ;;  %v399_v24 = vsel %vm379_vm10, %v1692_v28, 0.0  ;;  %vm434_vm11 = vcmp.eq.s32.totalorder %v1600_v1, %v1699_v31 }
  0xac   : >> { %v585_v25 = vadd.f32 %v569_v19, %v529_v63  ;;  %vm435_vm12 = vcmp.eq.s32.totalorder %v1605_v2, %v1699_v31  ;;  %v454_v26 = vsel %vm434_vm11, %v1695_v29, 0.0  ;;  %vm490_vm13 = vcmp.eq.s32.totalorder %v1600_v1, %v1701_v32 }
  0xad   : >> { %v455_v30 = vsel %vm435_vm12, %v1695_v29, 0.0  ;;  %v470_v27 = vadd.f32 %v454_v26, %v398_v23  ;;  %vm491_vm14 = vcmp.eq.s32.totalorder %v1605_v2, %v1701_v32  ;;  %v510_v28 = vsel %vm490_vm13, %v1704_v33, 0.0 }
  0xae   : >> { %v604_v36 = vpack.c.bf16 %v585_v25, %v584_v22  ;;  %v471_v37 = vadd.f32 %v455_v30, %v399_v24  ;;  %v511_v38 = vsel %vm491_vm14, %v1704_v33, 0.0  ;;  %vm546_vm15 = vcmp.eq.s32.totalorder %v1600_v1, %v1706_v34 }
  0xaf   : >> { %v526_v31 = vadd.f32 %v510_v28, %v470_v27  ;;  %vm547_vm0 = vcmp.eq.s32.totalorder %v1605_v2, %v1706_v34  ;;  %v566_v29 = vsel %vm546_vm15, %v1709_v35, 0.0 }
  0xb0   : >> { %914 = vmatpush3.bf16.msra.mxu0 %v604_v36  ;;  %v527_v39 = vadd.f32 %v511_v38, %v471_v37  ;;  %v567_v32 = vsel %vm547_vm0, %v1709_v35, 0.0 }
  0xb1   : >> { %915 = vmatprep.subr.bf16.mxu0 %v1331_v21  ;;  %v582_v40 = vadd.f32 %v566_v29, %v526_v31 }
  0xb2   : >> { %v583_v41 = vadd.f32 %v567_v32, %v527_v39 }
  0xb4   : >> { %v603_v33 = vpack.c.bf16 %v583_v41, %v582_v40 }
  0xb6   : >> { %916 = vmatpush3.bf16.msra.mxu0 %v603_v33 }
  0xb9   : >> { %918 = vmatmul.mubr.bf16.vlgmr.msra.gmra.mxu0 %v602_v42 }
 0x179   : >> { %v645_v43 = vpop.f32.mrf.mxu0 }
 0x17a   : >> { %v651_v44 = vadd.f32 %v1316_v20, %v645_v43  }
 0x17b   : >> { %v919_v34 = vpop.f32.mrf.mxu0  ;;  %368 = sbr.rel (!%p365_p10) target bundleno = 124 (0x7c), region = 116 }
 0x17c   : >> { %v2028_v20 = vmov %v651_v44  ;;  %v2029_v19 = vmov (%p365_p10), %v651_v44 }
 0x17d   : >> { %v648_v45 = vpop.f32.mrf.mxu0 }
 0x17f   : >> { %v920_v46 = vpop.f32.mrf.mxu0 }
 0x180 PF: > { %v652_v20 = vld [vmem:[%s289_s21] sm:$0xf]  ;;  %v1333_v21 = vmov 0   ;;  %v1334_v35 = vmov 2   ;;  %v1335_v47 = vmov 1   ;;  %v1336_v48 = vmov 3   ;;  %v1324_v19 = vphi %v1667_v19, %v2029_v19  }
 0x181   : > { %1065 = vset.pattern.permute.xlu0 %v1333_v21  ;;  %1067 = vset.pattern.permute.xlu1 %v1334_v35  ;;  %v660_v2 = vsub.s32 0, %v1600_v1  ;;  %v670_v3 = vsub.s32 1, %v1600_v1  ;;  %v680_v5 = vsub.s32 2, %v1600_v1  ;;  %v690_v7 = vsub.s32 3, %v1600_v1  ;;  %s887_s22 = sshll.u32 %s1300_s8, 1  ;;  %s711_s13 = sshll.u32 %s328_s17, 4  ;;  %s712_s13 = int_to_ptr.vmem [resolvable:$true] %s711_s13 }
 0x182   : > { %655 = vperm.xlu0 %1065, %v652_v20   ;;  %675 = vperm.xlu1 %1067, %v652_v20   ;;  %s707_s18 = sadd.s32 %s1296_s7, %s887_s22  ;;  %s2031_s24 = sld [smem:[#allocation25_spill]] }
 0x183   : > { %v661_v8 = vrot.slane %v1324_v19, %v660_v2  ;;  %v671_v9 = vrot.slane %v1324_v19, %v670_v3  ;;  %v681_v10 = vrot.slane %v1324_v19, %v680_v5  ;;  %v691_v11 = vrot.slane %v1324_v19, %v690_v7  ;;  %s888_s26 = sshll.u32 %s707_s18, 6  ;;  %s696_s25 = scalar_lea.sflag [#allocation7], %s1571_s0 }
 0x184   : > { %s1170_s23 = scalar_lea.vmem %s712_s13, 64  ;;  %s1337_s7 = smov [#allocation11]  }
 0x185   : > { %p1171_p12 = scmp.ne.s32.totalorder %s712_s13, %s1170_s23  ;;  %s1174_s9 = sshll.u32 %s1337_s7, 4  ;;  %s1175_s9 = int_to_ptr.vmem [resolvable:$false] %s1174_s9 }
 0x186   : > { %1066 = vset.pattern.permute.xlu0 %v1335_v47  ;;  %1068 = vset.pattern.permute.xlu1 %v1336_v48  ;;  %s1176_s16 = scalar_lea.vmem %s1175_s9, 128  ;;  %p1177_p5 = scmp.lt.s32.totalorder %s712_s13, %s1175_s9 }
 0x187   : > { %665 = vperm.xlu0 %1066, %v652_v20   ;;  %685 = vperm.xlu1 %1068, %v652_v20   ;;  %p1172_p11 = pnand %p1171_p12, %p1467_p9  ;;  %p1178_p2 = scmp.lt.s32.totalorder %s1176_s16, %s1170_s23 }
 0x188   : > { %s709_s20 = scalar_lea.hbm %s2031_s24, %s888_s26 }
 0x189   : > { %p1173_p3 = pneg %p1172_p11  ;;  %p1179_p6 = por %p1178_p2, %p1177_p5 }
 0x18b   : > { %1069 = vset.pattern.permute.xlu0 %v1336_v48  ;;  %p1180_p4 = pnand %p1179_p6, %p1173_p3 }
 0x1fd   : > { %v656_v4 = vpop.permute.xlu0 %655  ;;  %v676_v6 = vpop.permute.xlu1 %675 }
 0x1fe   : > { %v662_v14 = vmul.f32 %v661_v8, %v656_v4  ;;  %v682_v16 = vmul.f32 %v681_v10, %v676_v6 }
 0x202   : > { %v666_v12 = vpop.permute.xlu0 %665  ;;  %v686_v13 = vpop.permute.xlu1 %685 }
 0x203   : > { %v672_v15 = vmul.f32 %v671_v9, %v666_v12  ;;  %v692_v18 = vmul.f32 %v691_v11, %v686_v13 }
 0x205   : > { %v673_v17 = vadd.f32 %v672_v15, %v662_v14 }
 0x207   : > { %v683_v1 = vadd.f32 %v682_v16, %v673_v17 }
 0x209   : > { %v693_v49 = vadd.f32 %v692_v18, %v683_v1 }
 0x20b   : > { %694 = vst [vmem:[%s328_s17] sm:$0xf] %v693_v49 }
 0x20c   : > { %1183 = shalt.err (!%p1180_p4)
}
 0x20d   : > { %s1184_s12 = scalar_lea.hbm %s709_s20, 64  ;;  %s1188_s17 = scalar_lea.hbm %s2031_s24, 256 }
 0x20e   : > { %p1185_p0 = scmp.ne.s32.totalorder %s709_s20, %s1184_s12  ;;  %p1189_p7 = scmp.lt.s32.totalorder %s709_s20, %s2031_s24 }
 0x20f   : > { %p1190_p10 = scmp.lt.s32.totalorder %s1188_s17, %s1184_s12 }
 0x210   : > { %p1186_p1 = pnand %p1185_p0, %p1467_p9 }
 0x211   : > { %p1191_p12 = por %p1190_p10, %p1189_p7 }
 0x212   : > { %p1187_p8 = pneg %p1186_p1 }
 0x214   : > { %p1192_p11 = pnand %p1191_p12, %p1187_p8 }
 0x216   : > { %1195 = shalt.err (!%p1192_p11)
}
 0x217   : > { %927 = dma.vmem_to_hbm [thread:$0]  (%p1467_p9), %s712_s13, 64, %s709_s20, %s696_s25  }
 0x218 PF: > { %s2032_s15 = sld [smem:[#allocation17_spill]]  ;;  %p944_p3 = scmp.ge.s32.totalorder %s1312_s11, 2 }
 0x21a   : > { %p940_p5 = pnand %p944_p3, %p1477_p13 }
 0x21c   : > { %p941_p2 = pneg %p940_p5 }
 0x21e   : > { %s723_s18 = sand.u32 1, %s2032_s15  }
 0x21f   : > { %s724_s26 = scalar_lea.sflag [#allocation7], %s723_s18 }
 0x220   : > { %1267 = dma.done.wait (%p941_p2), %s724_s26, 64  }
 0x221   : > { %1269 = vsyncadd (%p941_p2), %s724_s26, 4294967232  ;;  %s31_s11 = sadd.s32 1, %s1312_s11   ;;  %s2034_s21 = sld [smem:[#allocation23_spill]] }
 0x222   : > { %p28_p6 = scmp.ge.s32.totalorder %s31_s11, 6   ;;  %s2035_s7 = sld [smem:[#allocation18_spill]] }
 0x223   : > { %s2036_s9 = sld [smem:[#allocation19_spill]]  ;;  %s2038_s27 = smov %s1276_s28 }
 0x224   : > { %s2037_s13 = sld [smem:[#allocation20_spill]]  ;;  %s2039_s28 = smov %s1280_s29 }
 0x225   : > { %s2040_s29 = smov %s1538_s3  ;;  %s2041_s0 = smov %s1288_s30 }
 0x226   : > { %s2042_s30 = smov %s1292_s1  ;;  %s2044_s8 = smov %s1308_s10 }
 0x227   : > { %s2043_s1 = smov %s2034_s21  ;;  %30 = sbr.rel (!%p28_p6) target bundleno = 19 (0x13), region = 127 }
 0x22a   : > { %s2045_s10 = smov %s2037_s13 }
 0x22c   :  { %729 = vsyncpa [#allocation6], 1 }
 0x22d   :  { %731 = vsyncpa [#allocation6 + $0x1], 1 }
 0x22e   :  { %732 = vsyncpa [#allocation9], 1 }
 0x22f   :  { %734 = vsyncpa [#allocation9 + $0x1], 1 }
 0x230   :  { %735 = vsyncpa [#allocation7], 1 }
 0x231   :  { %737 = vsyncpa [#allocation7 + $0x1], 1 }

</bundles_post_ra>
